<compile_context>
chip_gen: v7x
topology: tpu7x:2x2x1
jax: 0.10.0
libtpu: 0.0.40
codegen_flags: <defaults>
</compile_context>

<pallas_src>
import functools

import jax
import jax.numpy as jnp
from jax.experimental import pallas as pl
from jax.experimental.pallas import tpu as pltpu


def _multinet_kernel(patch_ref, wc_ref, cb_ref, wbd_ref, hb_ref, out_ref, acc_ref, *, inv_hw):
    """Grid = (batch, spatial_tiles). One fused conv+ReLU+pool+heads step per spatial tile."""
    m = pl.program_id(1)

    @pl.when(m == 0)
    def _():
        acc_ref[...] = jnp.zeros_like(acc_ref)

    # 3x3 conv of ALL heads at once as a single MXU matmul over this spatial tile:
    #   (tile_m, 9*Cin) @ (9*Cin, heads*Cout)
    y = jnp.dot(patch_ref[...], wc_ref[...], preferred_element_type=jnp.float32)
    y = jnp.maximum(y + cb_ref[...], 0.0)                 # bias + ReLU (VPU; free next to MXU)

    # Global-average-pool partial sum for this tile (XLU row reduce; no pool matmul).
    acc_ref[...] += jnp.sum(y, axis=0, keepdims=True)

    @pl.when(m == pl.num_programs(1) - 1)
    def _():
        feat = acc_ref[...] * inv_hw                      # (1, heads*Cout) pooled features
        # All per-head Linear(feature_dim -> 1) fused into one block-diagonal matmul
        # -> lane-dense (1, heads) row written directly.
        out_ref[...] = (jnp.dot(feat, wbd_ref[...], preferred_element_type=jnp.float32)
                        + hb_ref[...])


def _round_up(x, m):
    return (x + m - 1) // m * m


def _pick_tile(hw, want):
    """Largest t <= want with hw % t == 0 and (t % 8 == 0 or t == hw)."""
    want = min(want, hw)
    for t in range(want, 0, -1):
        if hw % t == 0 and (t % 8 == 0 or t == hw):
            return t
    return hw


def multinet_forward(x_nchw, conv_w, conv_b, head_w, head_b, *,
                     mxu_dtype=jnp.float32, tile_m=128):
    """Fused forward pass.

    x_nchw : (B, Cin, H, W)            PyTorch-layout input
    conv_w : (heads, Cout, Cin, 3, 3)  per-head Conv2d weights (torch OIHW layout)
    conv_b : (heads, Cout)             per-head Conv2d bias
    head_w : (heads, 1, Cout)          per-head Linear weight (torch layout)
    head_b : (heads, 1)                per-head Linear bias
    returns (B, heads) float32

    At scale: pass mxu_dtype=jnp.bfloat16 and tile_m>=512 (double-buffered DMA hits ~85% of
    HBM roofline per measured tiling data; accumulation stays f32).
    """
    B, Cin, H, W = x_nchw.shape
    heads, Cout = conv_w.shape[0], conv_w.shape[1]
    HW = H * W
    K9 = 9 * Cin
    N = heads * Cout
    tm = _pick_tile(HW, tile_m)

    # NCHW -> NHWC, zero-pad, im2col with tap-major columns; only the (B, HW, 9*Cin) patch
    # is materialized for the kernel (streamed tile-by-tile by the BlockSpec pipeline).
    x = jnp.transpose(x_nchw, (0, 2, 3, 1)).astype(jnp.float32)
    xp = jnp.pad(x, ((0, 0), (1, 1), (1, 1), (0, 0)))
    taps = [xp[:, dy:dy + H, dx:dx + W, :] for dy in range(3) for dx in range(3)]
    patch = jnp.concatenate(taps, axis=-1).reshape(B, HW, K9).astype(mxu_dtype)

    # All heads' conv weights fused: wc[(dy*3+dx)*Cin + c, h*Cout + o] = conv_w[h, o, c, dy, dx]
    wc = jnp.transpose(conv_w, (3, 4, 2, 0, 1)).reshape(K9, N).astype(mxu_dtype)
    cb = conv_b.reshape(1, N).astype(jnp.float32)

    # Block-diagonal fused head weights: wbd[h*Cout + c, g] = head_w[h, 0, c] * (h == g)
    wbd = (head_w[:, 0, :, None].astype(jnp.float32)
           * jnp.eye(heads, dtype=jnp.float32)[:, None, :]).reshape(N, heads)
    hb = head_b.reshape(1, heads).astype(jnp.float32)

    # VMEM budget from padded tile footprints (keeps double-buffering alive on v7x's 64 MiB).
    isz = jnp.dtype(mxu_dtype).itemsize
    K9p, Np, hp = _round_up(K9, 128), _round_up(N, 128), _round_up(heads, 128)
    vmem_bytes = (2 * _round_up(tm, 8) * K9p * isz            # patch double-buffer
                  + 2 * _round_up(K9, 8) * Np * isz           # fused conv weights
                  + 2 * (8 * Np + _round_up(N, 8) * hp + 16 * hp) * 4   # cb, wbd, hb, out
                  + 8 * Np * 4                                # pooled-sum scratch
                  + 2 * _round_up(tm, 8) * Np * 4)            # f32 conv intermediate headroom
    vmem_limit = int(min(max(2 * vmem_bytes, 8 << 20), 120 << 20))

    flops = 2 * B * HW * K9 * N + 2 * B * N * heads
    bytes_accessed = (B * HW * K9 * isz + K9 * N * isz
                      + (N + N * heads + heads) * 4 + B * heads * 4)

    kernel = functools.partial(_multinet_kernel, inv_hw=1.0 / float(HW))

    out3 = pl.pallas_call(
        kernel,
        out_shape=jax.ShapeDtypeStruct((B, 1, heads), jnp.float32),
        grid_spec=pltpu.PrefetchScalarGridSpec(
            num_scalar_prefetch=0,
            grid=(B, HW // tm),
            in_specs=[
                pl.BlockSpec((None, tm, K9), lambda b, m: (b, m, 0)),   # streamed patch tile
                pl.BlockSpec((K9, N), lambda b, m: (0, 0)),             # fused conv weights
                pl.BlockSpec((1, N), lambda b, m: (0, 0)),              # conv bias
                pl.BlockSpec((N, heads), lambda b, m: (0, 0)),          # block-diag head weights
                pl.BlockSpec((1, heads), lambda b, m: (0, 0)),          # head bias
            ],
            out_specs=pl.BlockSpec((None, 1, heads), lambda b, m: (b, 0, 0)),
            scratch_shapes=[pltpu.VMEM((1, N), jnp.float32)],           # pooled-sum accumulator
        ),
        compiler_params=pltpu.CompilerParams(
            dimension_semantics=("parallel", "arbitrary"),
            vmem_limit_bytes=vmem_limit),
        cost_estimate=pl.CostEstimate(flops=flops, transcendentals=0,
                                      bytes_accessed=bytes_accessed),
    )(patch, wc, cb, wbd, hb)
    return out3.reshape(B, heads)


def reference_forward(x_nchw, conv_w, conv_b, head_w, head_b):
    """Pure-JAX reference with the PyTorch module's semantics (f32)."""
    heads = conv_w.shape[0]
    outs = []
    for h in range(heads):
        y = jax.lax.conv_general_dilated(
            x_nchw.astype(jnp.float32), conv_w[h].astype(jnp.float32),
            window_strides=(1, 1), padding=((1, 1), (1, 1)),
            dimension_numbers=('NCHW', 'OIHW', 'NCHW'))
        y = jnp.maximum(y + conv_b[h][None, :, None, None], 0.0)
        feat = jnp.mean(y, axis=(2, 3))                      # global average pool -> (B, Cout)
        outs.append(feat @ head_w[h].T + head_b[h])          # Linear(feature_dim, 1) -> (B, 1)
    return jnp.concatenate(outs, axis=-1)                    # (B, heads)


if __name__ == "__main__":
    # Small shapes consistent with the module: batch=2, channels=4, spatial=16,
    # heads=3, feature_dim (== backbone Cout) = 8.  tile_m=128 -> 2 spatial tiles per batch,
    # so the pipelined accumulator path is exercised.
    B, Cin, H, W = 2, 4, 16, 16
    heads, Cout = 3, 8

    key = jax.random.PRNGKey(0)
    kx, kcw, kcb, khw, khb = jax.random.split(key, 5)

    x = jax.random.normal(kx, (B, Cin, H, W), jnp.float32)
    conv_w = jax.random.normal(kcw, (heads, Cout, Cin, 3, 3), jnp.float32) * 0.1
    conv_b = jax.random.normal(kcb, (heads, Cout), jnp.float32) * 0.1
    head_w = jax.random.normal(khw, (heads, 1, Cout), jnp.float32) * 0.1
    head_b = jax.random.normal(khb, (heads, 1), jnp.float32) * 0.1

    fwd = jax.jit(multinet_forward)
    out = jax.block_until_ready(fwd(x, conv_w, conv_b, head_w, head_b))
    ref = jax.block_until_ready(reference_forward(x, conv_w, conv_b, head_w, head_b))

    assert out.shape == (B, heads), out.shape
    assert jnp.allclose(out, ref, atol=1e-4, rtol=1e-4), (out, ref)

    print("KERNEL_OK")
</pallas_src>

<mosaic_0001>
module attributes {stable_mosaic.version = 11 : i64} {
  func.func @_multinet_kernel(%arg0: i32, %arg1: i32, %arg2: memref<1x128x36xf32, #tpu.memory_space<vmem>>, %arg3: memref<36x24xf32, #tpu.memory_space<vmem>>, %arg4: memref<1x24xf32, #tpu.memory_space<vmem>>, %arg5: memref<24x3xf32, #tpu.memory_space<vmem>>, %arg6: memref<1x3xf32, #tpu.memory_space<vmem>>, %arg7: memref<1x1x3xf32, #tpu.memory_space<vmem>>, %arg8: memref<1x24xf32, #tpu.memory_space<vmem>>) attributes {dimension_semantics = [#tpu.dimension_semantics<parallel>, #tpu.dimension_semantics<arbitrary>], iteration_bounds = array<i64: 2, 2>, scalar_prefetch = 0 : i64, scratch_operands = 1 : i64, tpu.core_type = #tpu.core_type<tc>, window_params = [{transform_indices = @transform_0, window_bounds = array<i64: 1, 128, 36>}, {pipeline_mode = #tpu.pipeline_mode<synchronous>, transform_indices = @transform_1, window_bounds = array<i64: 36, 24>}, {pipeline_mode = #tpu.pipeline_mode<synchronous>, transform_indices = @transform_2, window_bounds = array<i64: 1, 24>}, {pipeline_mode = #tpu.pipeline_mode<synchronous>, transform_indices = @transform_3, window_bounds = array<i64: 24, 3>}, {pipeline_mode = #tpu.pipeline_mode<synchronous>, transform_indices = @transform_4, window_bounds = array<i64: 1, 3>}, {transform_indices = @transform_5, window_bounds = array<i64: 1, 1, 3>}]} {
    %c0_i32 = arith.constant 0 : i32
    %0 = arith.cmpi eq, %arg1, %c0_i32 : i32
    %1 = arith.extui %0 : i1 to i32
    %c0_i32_0 = arith.constant 0 : i32
    %2 = arith.cmpi ne, %1, %c0_i32_0 : i32
    scf.if %2 {
      %cst_14 = arith.constant 0.000000e+00 : f32
      %20 = vector.broadcast %cst_14 : f32 to vector<1x24xf32>
      %c0_15 = arith.constant 0 : index
      %c0_16 = arith.constant 0 : index
      %21 = vector.load %arg8[%c0_15, %c0_16] : memref<1x24xf32, #tpu.memory_space<vmem>>, vector<1x24xf32>
      tpu.vector_store %arg8[%c0_15, %c0_16], %20 {strides = array<i32>} : memref<1x24xf32, #tpu.memory_space<vmem>>, vector<1x24xf32>,
    } else {
    }
    %c0 = arith.constant 0 : index
    %c0_1 = arith.constant 0 : index
    %c0_2 = arith.constant 0 : index
    %3 = vector.load %arg2[%c0, %c0_1, %c0_2] : memref<1x128x36xf32, #tpu.memory_space<vmem>>, vector<1x128x36xf32>
    %4 = vector.shape_cast %3 : vector<1x128x36xf32> to vector<128x36xf32>
    %c0_3 = arith.constant 0 : index
    %c0_4 = arith.constant 0 : index
    %5 = vector.load %arg3[%c0_3, %c0_4] : memref<36x24xf32, #tpu.memory_space<vmem>>, vector<36x24xf32>
    %cst = arith.constant dense<0.000000e+00> : vector<128x24xf32>
    %6 = tpu.matmul %4, %5, %cst {dimension_numbers = #tpu.dot_dimension_numbers<[1], [0], [0], [1], [0, 0, 1, 1], [], []>} : vector<128x36xf32>, vector<36x24xf32>, vector<128x24xf32> -> vector<128x24xf32>
    %c0_5 = arith.constant 0 : index
    %c0_6 = arith.constant 0 : index
    %7 = vector.load %arg4[%c0_5, %c0_6] : memref<1x24xf32, #tpu.memory_space<vmem>>, vector<1x24xf32>
    %8 = vector.broadcast %7 : vector<1x24xf32> to vector<128x24xf32>
    %9 = arith.addf %6, %8 : vector<128x24xf32>
    %cst_7 = arith.constant 0.000000e+00 : f32
    %10 = vector.broadcast %cst_7 : f32 to vector<128x24xf32>
    %11 = arith.maximumf %9, %10 : vector<128x24xf32>
    %c0_8 = arith.constant 0 : index
    %c0_9 = arith.constant 0 : index
    %12 = vector.load %arg8[%c0_8, %c0_9] : memref<1x24xf32, #tpu.memory_space<vmem>>, vector<1x24xf32>
    %cst_10 = arith.constant dense<0.000000e+00> : vector<24xf32>
    %13 = vector.multi_reduction <add>, %11, %cst_10 [0] : vector<128x24xf32> to vector<24xf32>
    %14 = vector.shape_cast %13 : vector<24xf32> to vector<1x24xf32>
    %15 = arith.addf %12, %14 : vector<1x24xf32>
    %c0_11 = arith.constant 0 : index
    %c0_12 = arith.constant 0 : index
    %16 = vector.load %arg8[%c0_11, %c0_12] : memref<1x24xf32, #tpu.memory_space<vmem>>, vector<1x24xf32>
    tpu.vector_store %arg8[%c0_11, %c0_12], %15 {strides = array<i32>} : memref<1x24xf32, #tpu.memory_space<vmem>>, vector<1x24xf32>,
    %c1_i32 = arith.constant 1 : i32
    %17 = arith.cmpi eq, %arg1, %c1_i32 : i32
    %18 = arith.extui %17 : i1 to i32
    %c0_i32_13 = arith.constant 0 : i32
    %19 = arith.cmpi ne, %18, %c0_i32_13 : i32
    scf.if %19 {
      %c0_14 = arith.constant 0 : index
      %c0_15 = arith.constant 0 : index
      %20 = vector.load %arg8[%c0_14, %c0_15] : memref<1x24xf32, #tpu.memory_space<vmem>>, vector<1x24xf32>
      %cst_16 = arith.constant 3.906250e-03 : f32
      %21 = vector.broadcast %cst_16 : f32 to vector<1x24xf32>
      %22 = arith.mulf %20, %21 : vector<1x24xf32>
      %c0_17 = arith.constant 0 : index
      %c0_18 = arith.constant 0 : index
      %23 = vector.load %arg5[%c0_17, %c0_18] : memref<24x3xf32, #tpu.memory_space<vmem>>, vector<24x3xf32>
      %cst_19 = arith.constant dense<0.000000e+00> : vector<1x3xf32>
      %24 = tpu.matmul %22, %23, %cst_19 {dimension_numbers = #tpu.dot_dimension_numbers<[1], [0], [0], [1], [0, 0, 1, 1], [], []>} : vector<1x24xf32>, vector<24x3xf32>, vector<1x3xf32> -> vector<1x3xf32>
      %c0_20 = arith.constant 0 : index
      %c0_21 = arith.constant 0 : index
      %25 = vector.load %arg6[%c0_20, %c0_21] : memref<1x3xf32, #tpu.memory_space<vmem>>, vector<1x3xf32>
      %26 = arith.addf %24, %25 : vector<1x3xf32>
      %c0_22 = arith.constant 0 : index
      %c0_23 = arith.constant 0 : index
      %c0_24 = arith.constant 0 : index
      %27 = vector.load %arg7[%c0_22, %c0_23, %c0_24] : memref<1x1x3xf32, #tpu.memory_space<vmem>>, vector<1x1x3xf32>
      %28 = vector.shape_cast %27 : vector<1x1x3xf32> to vector<1x3xf32>
      %29 = vector.shape_cast %26 : vector<1x3xf32> to vector<1x1x3xf32>
      tpu.vector_store %arg7[%c0_22, %c0_23, %c0_24], %29 {strides = array<i32>} : memref<1x1x3xf32, #tpu.memory_space<vmem>>, vector<1x1x3xf32>,
    } else {
    }
    return
  }
  func.func @transform_0(%arg0: i32, %arg1: i32) -> (i32, i32, i32) {
    %c0_i32 = arith.constant 0 : i32
    %c0_i32_0 = arith.constant 0 : i32
    return %arg0, %arg1, %c0_i32 : i32, i32, i32
  }
  func.func @transform_1(%arg0: i32, %arg1: i32) -> (i32, i32) {
    %c0_i32 = arith.constant 0 : i32
    %c0_i32_0 = arith.constant 0 : i32
    %c0_i32_1 = arith.constant 0 : i32
    return %c0_i32, %c0_i32_0 : i32, i32
  }
  func.func @transform_2(%arg0: i32, %arg1: i32) -> (i32, i32) {
    %c0_i32 = arith.constant 0 : i32
    %c0_i32_0 = arith.constant 0 : i32
    %c0_i32_1 = arith.constant 0 : i32
    return %c0_i32, %c0_i32_0 : i32, i32
  }
  func.func @transform_3(%arg0: i32, %arg1: i32) -> (i32, i32) {
    %c0_i32 = arith.constant 0 : i32
    %c0_i32_0 = arith.constant 0 : i32
    %c0_i32_1 = arith.constant 0 : i32
    return %c0_i32, %c0_i32_0 : i32, i32
  }
  func.func @transform_4(%arg0: i32, %arg1: i32) -> (i32, i32) {
    %c0_i32 = arith.constant 0 : i32
    %c0_i32_0 = arith.constant 0 : i32
    %c0_i32_1 = arith.constant 0 : i32
    return %c0_i32, %c0_i32_0 : i32, i32
  }
  func.func @transform_5(%arg0: i32, %arg1: i32) -> (i32, i32, i32) {
    %c0_i32 = arith.constant 0 : i32
    %c0_i32_0 = arith.constant 0 : i32
    %c0_i32_1 = arith.constant 0 : i32
    return %arg0, %c0_i32, %c0_i32_0 : i32, i32, i32
  }
}

</mosaic_0001>

<bundles_post_ra>
// kernel: multinet_forward.1
= control target key start
LH: loop header
LB: loop body
LE: loop exit
PB: predicated region body
PF: predicated region fallthrough
CT: control target
= control target key end

     0   :  { %10 = vsyncpa [#allocation4], 0  ;;  %s1269_s0 = inlined_call_operand.vmem [shape: f32[2,256,36], index: 0, kind: input, shape index: {}]   ;;  %s1270_s1 = inlined_call_operand.vmem [shape: f32[36,24], index: 1, kind: input, shape index: {}]   ;;  %s1271_s2 = inlined_call_operand.vmem [shape: f32[1,24], index: 2, kind: input, shape index: {}]   ;;  %s1272_s3 = inlined_call_operand.vmem [shape: f32[24,3], index: 3, kind: input, shape index: {}]   ;;  %s1273_s4 = inlined_call_operand.vmem [shape: f32[1,3], index: 4, kind: input, shape index: {}]   ;;  %s1274_s5 = inlined_call_operand.hbm [shape: f32[2,1,3], index: 5, kind: output, shape index: {}]  }
   0x1   :  { %12 = vsyncpa [#allocation4 + $0x1], 0  ;;  %s1033_s18 = smov 0   ;;  %s1035_s19 = smov 0  }
   0x2   :  { %s1037_s20 = smov 0   ;;  %s1039_s21 = smov 0  }
   0x3   :  { %s1041_s22 = smov 0   ;;  %s1043_s23 = smov 0  }
   0x4   :  { %s1045_s24 = smov 0   ;;  %s1047_s25 = smov 0  }
   0x5 LB: > { %s710_s26 = sadd.s32 4294967295, %s996_s25   ;;  %s711_s27 = sadd.s32 4294967294, %s996_s25   ;;  %s996_s25 = sphi %s1047_s25, %s18_s25   ;;  %s992_s24 = sphi %s1045_s24, %s1283_s24   ;;  %s988_s23 = sphi %s1043_s23, %s1282_s23   ;;  %s984_s22 = sphi %s1041_s22, %s1281_s22   ;;  %s980_s21 = sphi %s1039_s21, %s1280_s21   ;;  %s976_s20 = sphi %s1037_s20, %s1279_s20   ;;  %s972_s19 = sphi %s1035_s19, %s1278_s19   ;;  %s968_s18 = sphi %s1033_s18, %s1277_s18  }
   0x6   : > { %s27_s28 = sadd.s32 1, %s988_s23  ;;  %s30_s29 = sadd.s32 1, %s992_s24 }
   0x7   : > { %p28_p0 = scmp.ge.s32.totalorder %s27_s28, 2  ;;  %p159_p1 = scmp.ne.s32.totalorder %s976_s20, %s972_s19 }
   0x8   : > { %p160_p2 = scmp.eq.s32.totalorder %s710_s26, 3  ;;  %p165_p4 = scmp.ne.s32.totalorder %s972_s19, %s968_s18 }
   0x9   : > { %s1285_s28 = smov (%p28_p0, %s27_s28), 0  ;;  %s1287_s29 = smov (!%p28_p0, %s30_s29), %s992_s24 }
   0xa   : > { %p1082_p3 = por %p160_p2, %p159_p1  ;;  %p32_p5 = scmp.ge.s32.totalorder %s1287_s29, 2 }
   0xb   : > { %p166_p6 = scmp.eq.s32.totalorder %s711_s27, 3  ;;  %p714_p7 = scmp.ge.s32.totalorder %s996_s25, 1 }
   0xc   : > { %p209_p8 = scmp.lt.s32.totalorder %s996_s25, 5  ;;  %s1289_s29 = smov (%p32_p5, %s1287_s29), 0 }
   0xd   : > { %p1092_p9 = por %p166_p6, %p165_p4  ;;  %s146_s7 = ssub.s32 %s992_s24, %s1289_s29 }
   0xe   : > { %p210_p10 = pnand %p714_p7, %p209_p8  ;;  %s149_s8 = sadd.s32 1, %s976_s20 }
   0xf   : > { %p147_p11 = scmp.eq.s32.totalorder %s146_s7, 0  ;;  %s238_s10 = sand.u32 (!%p210_p10), 1, %s972_s19  }
  0x10   : > { %213 = sbr.rel (%p210_p10) target bundleno = 557 (0x22d), region = 40  ;;  %s715_s11 = sshll.u32 (!%p210_p10), %s980_s21, 4 }
  0x11   : > { %s1100_s9 = scalar_select %p147_p11, %s976_s20, %s149_s8  }
  0x12   : > { %p241_p12 = scmp.lt.s32.totalorder (!%p210_p10), %s984_s22, 1  ;;  %p243_p13 = scmp.lt.s32.totalorder (!%p210_p10), %s715_s11, 31 }
  0x13   : > { %s1113_s27 = scalar_lea.vmem (!%p210_p10), [#allocation3], %s238_s10  ;;  %p718_p0 = scmp.ne.s32.totalorder (!%p210_p10), %s980_s21, 0 }
  0x17   : > { %s242_s12 = scalar_select %p241_p12, %s984_s22, 1 }
  0x18   : > { %s1291_s11 = smov (!%p243_p13, %s715_s11), 31  ;;  %253 = sbr.rel (%p718_p0) target bundleno = 31 (0x1f), region = 44 }
  0x19   : > { %s716_s13 = sshll.u32 %s242_s12, 5  ;;  %vm254_vm0 = vcmask (!%p718_p0), 188416   ;;  %v998_v0 = vmov (!%p718_p0), 0.0  }
  0x1a   : > { %s246_s14 = sadd.s32 %s716_s13, %s1291_s11  ;;  %255 = vst.msk [vmem:[#allocation2] sm:$0x1] (!%p718_p0), %vm254_vm0, %v998_v0 }
  0x1b   : > { %s717_s15 = sshll.u32 %s246_s14, 3 }
  0x1c   : > { %s1109_s26 = scalar_lea.vmem %s1269_s0, %s717_s15 }
  0x1f PF: > { %v272_v1 = vld [vmem:[%s1270_s1] sm:$0xff]  ;;  %v273_v2 = vld [vmem:[%s1270_s1 + $0x8] sm:$0xff]  ;;  %v274_v3 = vld [vmem:[%s1270_s1 + $0x10] sm:$0xff]  ;;  %vm284_vm1 = vcmask 293888   ;;  %vm333_vm2 = vcmask 1043456   ;;  %vm499_vm3 = vcmask 195584  }
  0x20   : > { %v810_v4 = vpack.c.bf16 %v273_v2, %v272_v1  ;;  %v275_v5 = vld [vmem:[%s1270_s1 + $0x18] sm:$0xff]  ;;  %v256_v6 = vld [vmem:[%s1109_s26] sm:$0xff]  ;;  %v257_v10 = vld [vmem:[%s1109_s26 + $0x8] sm:$0xff]  ;;  %vm538_vm4 = vcmask 188416   ;;  %p737_p1 = scmp.ne.s32.totalorder %s980_s21, 1 }
  0x21   : > { %v814_v7 = vpack.c.bf16 %v275_v5, %v274_v3  ;;  %777 = vmatprep.mubr.msk.f32.mxu0 %vm284_vm1, %v256_v6  ;;  %v264_v8 = vld [vmem:[%s1109_s26 + $0x40] sm:$0xff]  ;;  %v265_v11 = vld [vmem:[%s1109_s26 + $0x48] sm:$0xff]  ;;  %v258_v12 = vld [vmem:[%s1109_s26 + $0x10] sm:$0xff]  ;;  %vm1000_vm5 = vmmov (!%p737_p1), 0   ;;  %vm623_vm6 = vcmask (!%p737_p1), 16384  }
  0x22   : > { %811 = vmatprep.subr.bf16.mxu0 %v810_v4  ;;  %821 = vmatprep.subr.bf16.mxu1 %v810_v4  ;;  %v276_v9 = vld [vmem:[%s1270_s1 + $0x20] sm:$0xf]  ;;  %v266_v13 = vld [vmem:[%s1109_s26 + $0x50] sm:$0xff]  ;;  %v259_v14 = vld [vmem:[%s1109_s26 + $0x18] sm:$0xff] }
  0x23   : > { %813 = vmatpush3.bf16.msra.mxu0 %v810_v4  ;;  %824 = vmatpush3.bf16.msra.mxu1 %v810_v4  ;;  %v267_v15 = vld [vmem:[%s1109_s26 + $0x58] sm:$0xff]  ;;  %v260_v16 = vld [vmem:[%s1109_s26 + $0x20] sm:$0xff]  ;;  %v261_v18 = vld [vmem:[%s1109_s26 + $0x28] sm:$0xff] }
  0x24   : > { %815 = vmatprep.subr.bf16.mxu0 %v814_v7  ;;  %822 = vmatprep.subr.bf16.mxu1 %v814_v7  ;;  %v268_v17 = vld [vmem:[%s1109_s26 + $0x60] sm:$0xff]  ;;  %v269_v19 = vld [vmem:[%s1109_s26 + $0x68] sm:$0xff]  ;;  %v262_v20 = vld [vmem:[%s1109_s26 + $0x30] sm:$0xff] }
  0x25   : > { %789 = vmatprep.mubr.msk.f32.mxu1 %vm284_vm1, %v264_v8  ;;  %v270_v21 = vld [vmem:[%s1109_s26 + $0x70] sm:$0xff]  ;;  %v263_v22 = vld [vmem:[%s1109_s26 + $0x38] sm:$0xff]  ;;  %v1166_v24 = vld [vmem:[%s1271_s2] ss:$0 sm:$0xff] }
  0x26   : > { %v271_v23 = vld [vmem:[%s1109_s26 + $0x78] sm:$0xff] }
  0x27   : > { %817 = vmatpush3.bf16.msra.mxu0 %v814_v7  ;;  %825 = vmatpush3.bf16.msra.mxu1 %v814_v7 }
  0x28   : > { %775 = vmatprep.subr.msk.mxu0 %vm333_vm2, %v276_v9  ;;  %823 = vmatprep.subr.msk.mxu1 %vm333_vm2, %v276_v9 }
  0x2b   : > { %776 = vmatpush3.msk.msra.mxu0 %vm333_vm2, %v276_v9  ;;  %826 = vmatpush3.msk.msra.mxu1 %vm333_vm2, %v276_v9 }
  0x2c   : > { %778 = vmatmul.mubr.msk.f32.vlgmr.msra.gmra.mrb[0].mxu0 %vm284_vm1, %v257_v10  ;;  %790 = vmatmul.mubr.msk.f32.vlgmr.msra.gmra.mrb[0].mxu1 %vm284_vm1, %v265_v11 }
  0x2d   : > { %780 = vmatprep.mubr.msk.f32.mxu0 %vm284_vm1, %v258_v12  ;;  %792 = vmatprep.mubr.msk.f32.mxu1 %vm284_vm1, %v266_v13 }
  0x30   : > { %781 = vmatmul.mubr.msk.f32.gmra.mrb[2].mxu0 %vm284_vm1, %v259_v14  ;;  %793 = vmatmul.mubr.msk.f32.gmra.mrb[2].mxu1 %vm284_vm1, %v267_v15 }
  0x31   : > { %783 = vmatprep.mubr.msk.f32.mxu0 %vm284_vm1, %v260_v16  ;;  %795 = vmatprep.mubr.msk.f32.mxu1 %vm284_vm1, %v268_v17 }
  0x34   : > { %784 = vmatmul.mubr.msk.f32.gmra.mrb[4].mxu0 %vm284_vm1, %v261_v18  ;;  %796 = vmatmul.mubr.msk.f32.gmra.mrb[4].mxu1 %vm284_vm1, %v269_v19 }
  0x35   : > { %786 = vmatprep.mubr.msk.f32.mxu0 %vm284_vm1, %v262_v20  ;;  %798 = vmatprep.mubr.msk.f32.mxu1 %vm284_vm1, %v270_v21 }
  0x38   : > { %787 = vmatmul.mubr.msk.f32.gmra.mrb[6].mxu0 %vm284_vm1, %v263_v22  ;;  %799 = vmatmul.mubr.msk.f32.gmra.mrb[6].mxu1 %vm284_vm1, %v271_v23 }
  0xff   : > { %v779_v25 = vpop.f32.mrb[0].mxu0  ;;  %v791_v26 = vpop.f32.mrb[0].mxu1 }
 0x100   : > { %v409_v27 = vadd.f32 %v779_v25, %v1166_v24  ;;  %v403_v28 = vpop.f32.mrb[1].mxu0  ;;  %v443_v29 = vpop.f32.mrb[1].mxu1  ;;  %v449_v1 = vadd.f32 %v791_v26, %v1166_v24 }
 0x101   : > { %v404_v30 = vadd.f32 %v1166_v24, %v403_v28  ;;  %v444_v52 = vadd.f32 %v1166_v24, %v443_v29 }
 0x102   : > { %v483_v31 = vmax.f32 %v409_v27, 0.0  ;;  %v491_v10 = vmax.f32 %v449_v1, 0.0 }
 0x103   : > { %v482_v32 = vmax.f32 %v404_v30, 0.0  ;;  %v782_v33 = vpop.f32.mrb[2].mxu0  ;;  %v794_v34 = vpop.f32.mrb[2].mxu1  ;;  %v490_v2 = vmax.f32 %v444_v52, 0.0  ;;  %v1001_v52 = vmov (!%p737_p1), 0.0  }
 0x104   : > { %v501_v35 = vsel %vm499_vm3, %v483_v31, 0.0  ;;  %v419_v36 = vadd.f32 %v782_v33, %v1166_v24  ;;  %v413_v37 = vpop.f32.mrb[3].mxu0  ;;  %v453_v38 = vpop.f32.mrb[3].mxu1  ;;  %v459_v11 = vadd.f32 %v794_v34, %v1166_v24  ;;  %v517_v17 = vsel %vm499_vm3, %v491_v10, 0.0  ;;  %807 = vmatprep.mubr.msk.f32.mxu0 (!%p737_p1), %vm1000_vm5, %v1001_v52 }
 0x105   : > { %v500_v39 = vsel %vm499_vm3, %v482_v32, 0.0  ;;  %v414_v40 = vadd.f32 %v1166_v24, %v413_v37  ;;  %v454_v6 = vadd.f32 %v1166_v24, %v453_v38  ;;  %v515_v13 = vsel %vm499_vm3, %v490_v2, 0.0 }
 0x106   : > { %v502_v41 = vadd.f32 %v501_v35, %v500_v39  ;;  %v485_v42 = vmax.f32 %v419_v36, 0.0  ;;  %v493_v19 = vmax.f32 %v459_v11, 0.0 }
 0x107   : > { %v484_v43 = vmax.f32 %v414_v40, 0.0  ;;  %v785_v44 = vpop.f32.mrb[4].mxu0  ;;  %v797_v45 = vpop.f32.mrb[4].mxu1  ;;  %v492_v14 = vmax.f32 %v454_v6, 0.0 }
 0x108   : > { %v429_v46 = vadd.f32 %v785_v44, %v1166_v24  ;;  %v423_v47 = vpop.f32.mrb[5].mxu0  ;;  %v463_v48 = vpop.f32.mrb[5].mxu1  ;;  %v505_v53 = vsel %vm499_vm3, %v485_v42, 0.0  ;;  %v469_v21 = vadd.f32 %v797_v45, %v1166_v24  ;;  %v521_v26 = vsel %vm499_vm3, %v493_v19, 0.0 }
 0x109   : > { %v503_v49 = vsel %vm499_vm3, %v484_v43, 0.0  ;;  %v424_v50 = vadd.f32 %v1166_v24, %v423_v47  ;;  %v464_v15 = vadd.f32 %v1166_v24, %v463_v48  ;;  %v519_v20 = vsel %vm499_vm3, %v492_v14, 0.0  ;;  %v546_v48 = vld [vmem:[%s1272_s3] sm:$0xff] (!%p737_p1) }
 0x10a   : > { %v504_v51 = vadd.f32 %v503_v49, %v502_v41  ;;  %v487_v54 = vmax.f32 %v429_v46, 0.0  ;;  %v495_v28 = vmax.f32 %v469_v21, 0.0  ;;  %v498_v46 = vld [vmem:[#allocation2] sm:$0x1]  ;;  %v547_v49 = vld [vmem:[%s1272_s3 + $0x8] sm:$0xff] (!%p737_p1) }
 0x10b   : > { %v486_v55 = vmax.f32 %v424_v50, 0.0  ;;  %v788_v56 = vpop.f32.mrb[6].mxu0  ;;  %v800_v57 = vpop.f32.mrb[6].mxu1  ;;  %v494_v22 = vmax.f32 %v464_v15, 0.0  ;;  %v999_v50 = vmov (!%p737_p1), 0.0|0.0  }
 0x10c   : > { %v506_v58 = vadd.f32 %v505_v53, %v504_v51  ;;  %v439_v59 = vadd.f32 %v788_v56, %v1166_v24  ;;  %v433_v60 = vpop.f32.mrb[7].mxu0  ;;  %v473_v61 = vpop.f32.mrb[7].mxu1  ;;  %v509_v3 = vsel %vm499_vm3, %v487_v54, 0.0  ;;  %v479_v30 = vadd.f32 %v800_v57, %v1166_v24  ;;  %818 = vmatprep.subr.bf16.mxu0 (!%p737_p1), %v999_v50  ;;  %v548_v54 = vld [vmem:[%s1272_s3 + $0x10] sm:$0xff] (!%p737_p1)  ;;  %v549_v56 = vld [vmem:[%s1273_s4] sm:$0x1] (!%p737_p1) }
 0x10d   : > { %v507_v62 = vsel %vm499_vm3, %v486_v55, 0.0  ;;  %v434_v63 = vadd.f32 %v1166_v24, %v433_v60  ;;  %v474_v23 = vadd.f32 %v1166_v24, %v473_v61  ;;  %v523_v29 = vsel %vm499_vm3, %v494_v22, 0.0 }
 0x10e   : > { %v508_v0 = vadd.f32 %v507_v62, %v506_v58  ;;  %v489_v4 = vmax.f32 %v439_v59, 0.0  ;;  %v525_v34 = vsel %vm499_vm3, %v495_v28, 0.0  ;;  %v497_v35 = vmax.f32 %v479_v30, 0.0 }
 0x10f   : > { %v488_v5 = vmax.f32 %v434_v63, 0.0  ;;  %v496_v31 = vmax.f32 %v474_v23, 0.0  ;;  %v819_v51 = vpack.c.bf16 (!%p737_p1), %v547_v49, %v546_v48 }
 0x110   : > { %v510_v7 = vadd.f32 %v509_v3, %v508_v0  ;;  %v513_v12 = vsel %vm499_vm3, %v489_v4, 0.0  ;;  %v529_v39 = vsel %vm499_vm3, %v497_v35, 0.0 }
 0x111   : > { %v511_v8 = vsel %vm499_vm3, %v488_v5, 0.0  ;;  %v527_v36 = vsel %vm499_vm3, %v496_v31, 0.0  ;;  %820 = vmatpush3.bf16.msra.mxu0 (!%p737_p1), %v819_v51 }
 0x112   : > { %v512_v9 = vadd.f32 %v511_v8, %v510_v7  ;;  %805 = vmatprep.subr.mxu0 (!%p737_p1), %v1001_v52 }
 0x114   : > { %v514_v16 = vadd.f32 %v513_v12, %v512_v9 }
 0x115   : > { %806 = vmatpush3.msra.mxu0 (!%p737_p1), %v548_v54 }
 0x116   : > { %v516_v18 = vadd.f32 %v515_v13, %v514_v16 }
 0x118   : > { %v518_v25 = vadd.f32 %v517_v17, %v516_v18 }
 0x11a   : > { %v520_v27 = vadd.f32 %v519_v20, %v518_v25 }
 0x11c   : > { %v522_v32 = vadd.f32 %v521_v26, %v520_v27 }
 0x11e   : > { %v524_v33 = vadd.f32 %v523_v29, %v522_v32 }
 0x120   : > { %v526_v37 = vadd.f32 %v525_v34, %v524_v33 }
 0x122   : > { %v528_v38 = vadd.f32 %v527_v36, %v526_v37 }
 0x124   : > { %v530_v40 = vadd.f32 %v529_v39, %v528_v38 }
 0x126   : > { %v531_v41 = vrot.slane %v530_v40, 4 }
 0x128   : > { %v532_v42 = vadd.f32 %v531_v41, %v530_v40 }
 0x12a   : > { %v533_v43 = vrot.slane %v532_v42, 2 }
 0x12c   : > { %v534_v44 = vadd.f32 %v533_v43, %v532_v42 }
 0x12e   : > { %v535_v45 = vrot.slane %v534_v44, 1  ;;  %543 = sbr.rel (%p737_p1) target bundleno = 533 (0x215), region = 48 }
 0x130   : > { %v536_v24 = vadd.f32 %v535_v45, %v534_v44 }
 0x132   : > { %v537_v47 = vadd.f32 %v536_v24, %v498_v46 }
 0x134   : > { %539 = vst.msk [vmem:[#allocation2] sm:$0x1] %vm538_vm4, %v537_v47 }
 0x13b   : > { %v544_v53 = vld [vmem:[#allocation2] sm:$0x1] }
 0x13c   : > { %v545_v55 = vmul.f32 0.00390625, %v544_v53 }
 0x13e   : > { %808 = vmatmul.mubr.msk.f32.vlgmr.msra.gmra.mrb[0].mxu0 %vm499_vm3, %v545_v55 }
 0x211   : > { %v619_v57 = vpop.f32.mrb[0].mxu0 }
 0x212   : > { %v620_v58 = vadd.f32 %v619_v57, %v549_v56  ;;  %v809_v59 = vpop.f32.mrb[1].mxu0 }
 0x214   : > { %624 = vst.msk [vmem:[%s1113_s27] sm:$0x1] %vm623_vm6, %v620_v58 }
 0x215 PF: > { %s739_s7 = sshll.u32 %s984_s22, 4  ;;  %s638_s12 = sshll.u32 %s1113_s27, 4  ;;  %s639_s12 = int_to_ptr.vmem [resolvable:$true] %s638_s12 }
 0x216   : > { %s1219_s26 = scalar_lea.hbm %s1274_s5, %s739_s7  ;;  %s626_s13 = scalar_lea.sflag [#allocation4], %s238_s10 }
 0x217   : > { %s902_s14 = scalar_lea.vmem %s639_s12, 16  ;;  %s1002_s21 = smov [#allocation3]  }
 0x218   : > { %p903_p2 = scmp.ne.s32.totalorder %s639_s12, %s902_s14  ;;  %s906_s15 = sshll.u32 %s1002_s21, 4  ;;  %s907_s15 = int_to_ptr.vmem [resolvable:$false] %s906_s15 }
 0x219   : > { %s908_s16 = scalar_lea.vmem %s907_s15, 32  ;;  %p909_p6 = scmp.lt.s32.totalorder %s639_s12, %s907_s15 }
 0x21a   : > { %p904_p4 = pnand %p903_p2, %p1082_p3  ;;  %p910_p7 = scmp.lt.s32.totalorder %s908_s16, %s902_s14 }
 0x21c   : > { %p905_p5 = pneg %p904_p4  ;;  %p911_p8 = por %p910_p7, %p909_p6 }
 0x21e   : > { %p912_p10 = pnand %p911_p8, %p905_p5 }
 0x220   : > { %915 = shalt.err (!%p912_p10)
}
 0x221   : > { %s916_s22 = scalar_lea.hbm %s1219_s26, 16  ;;  %s920_s17 = scalar_lea.hbm %s1274_s5, 32 }
 0x222   : > { %p917_p11 = scmp.ne.s32.totalorder %s1219_s26, %s916_s22  ;;  %p921_p0 = scmp.lt.u32.totalorder %s1219_s26, %s1274_s5 }
 0x223   : > { %p922_p1 = scmp.lt.u32.totalorder %s920_s17, %s916_s22  ;;  %p924_p4 = scmp.lt.u32.totalorder %s916_s22, %s1219_s26 }
 0x224   : > { %p918_p12 = pnand %p917_p11, %p1082_p3 }
 0x225   : > { %p923_p2 = por %p922_p1, %p921_p0 }
 0x226   : > { %p919_p13 = pneg %p918_p12 }
 0x227   : > { %p925_p5 = por %p924_p4, %p923_p2 }
 0x229   : > { %p926_p6 = pnand %p925_p5, %p919_p13 }
 0x22b   : > { %929 = shalt.err (!%p926_p6)
}
 0x22c   : > { %827 = dma.vmem_to_hbm [thread:$0]  (%p1082_p3), %s639_s12, 16, %s1219_s26, %s626_s13  }
 0x22d PF: > { %p833_p7 = scmp.ge.s32.totalorder %s996_s25, 2  ;;  %s650_s11 = sand.u32 1, %s968_s18  }
 0x22e   : > { %s651_s14 = scalar_lea.sflag [#allocation4], %s650_s11 }
 0x22f   : > { %p830_p8 = pnand %p833_p7, %p1092_p9 }
 0x231   : > { %963 = dma.done.wait (!%p830_p8), %s651_s14, 16  }
 0x232   : > { %965 = vsyncadd (!%p830_p8), %s651_s14, 4294967280  ;;  %s18_s25 = sadd.s32 1, %s996_s25   ;;  %s1277_s18 = smov %s972_s19 }
 0x233   : > { %p15_p10 = scmp.ge.s32.totalorder %s18_s25, 6   ;;  %s1278_s19 = smov %s976_s20 }
 0x234   : > { %s1279_s20 = smov %s1100_s9  ;;  %s1280_s21 = smov %s988_s23 }
 0x235   : > { %s1281_s22 = smov %s992_s24  ;;  %s1282_s23 = smov %s1285_s28 }
 0x236   : > { %s1283_s24 = smov %s1289_s29  ;;  %17 = sbr.rel (!%p15_p10) target bundleno = 5 (0x5), region = 83 }
 0x23d   :  { %655 = vsyncpa [#allocation4], 1 }
 0x23e   :  { %657 = vsyncpa [#allocation4 + $0x1], 1 }

</bundles_post_ra>
